<compile_context>
chip_gen: v7x
topology: tpu7x:2x2x1
jax: 0.10.0
libtpu: 0.0.40
codegen_flags: <defaults>
</compile_context>

<pallas_src>
import jax
import jax.numpy as jnp
from jax.experimental import pallas as pl
from jax.experimental.pallas import tpu as pltpu


# --------------------------------------------------------------------------- #
# Planning helpers
# --------------------------------------------------------------------------- #
def _vmem_capacity_bytes():
    try:
        cap = getattr(pltpu.get_tpu_info(), "vmem_capacity_bytes", None)
        if cap:
            return int(cap)
    except Exception:
        pass
    return 64 * 1024 * 1024  # conservative (v7x-sized) fallback


def _divisors(n):
    return [d for d in range(1, n + 1) if n % d == 0]


def _footprint_bytes(TB, TKJ, K, C_in, C_out, in_b, out_b, nj):
    x_blk = 2 * TB * TKJ * C_in * in_b            # pipelined input block (2-deep)
    adj_blk = (1 if nj == 1 else 2) * K * TKJ * in_b
    out_blk = 2 * K * TB * C_out * out_b
    wt = C_in * C_out * in_b
    bias = TB * C_out * 4
    acc = K * TB * C_out * 4                      # f32 accumulator scratch
    tmp = TB * TKJ * (C_in + 3 * C_out) * 4       # support / relayout temporaries
    return x_blk + adj_blk + out_blk + wt + bias + acc + tmp


def _plan_blocks(B, K, C_in, C_out, in_b, out_b, cap):
    """Pick (TB, TKJ): batch-block and adjacency-contraction-block sizes."""
    budget = int(cap * 0.55)
    # Output block last dim is TB*C_out -> must be a multiple of 128 or full (TB==B).
    tb_all = [d for d in _divisors(B) if d == B or (d * C_out) % 128 == 0]
    # Bound the unrolled batch->lane relayout and keep the MXU N dim sane.
    tb_pref = [d for d in tb_all if d <= 64 and d * C_out <= 4096] or tb_all
    tb_cands = sorted(set(tb_pref), reverse=True)
    # x block second-to-last dim and adj block last dim are TKJ.
    tkj_cands = sorted([d for d in _divisors(K) if d == K or d % 128 == 0],
                       reverse=True)
    multi_tc = cap <= 80 * 1024 * 1024            # v7x-sized part: 2 TCs share the grid

    for tkj in tkj_cands:                         # prefer full-K residency first
        nj = K // tkj
        fit = [tb for tb in tb_cands
               if _footprint_bytes(tb, tkj, K, C_in, C_out, in_b, out_b, nj) <= budget]
        if not fit:
            continue
        if multi_tc:
            even = [tb for tb in fit if (B // tb) >= 2 and (B // tb) % 2 == 0]
            return (even[0] if even else fit[0]), tkj
        return fit[0], tkj                        # 1-TC parts: largest fitting block
    # TODO(synk): output-row (k) tiling of adj for plans that still do not fit.
    return tb_cands[-1], tkj_cands[-1]


def _vmem_limit_bytes(needed, cap):
    return int(min(max(needed * 1.25, 32 * 1024 * 1024), cap * 0.85))


# --------------------------------------------------------------------------- #
# Kernel
# --------------------------------------------------------------------------- #
def _gcn_kernel(x_ref, wt_ref, adj_ref, b_ref, o_ref, acc_ref):
    # x_ref:   (TB, TKJ, C_in)   batch-block x contraction-block of the input
    # wt_ref:  (C_in, C_out)     W^T, grid-invariant
    # adj_ref: (K, TKJ)          adjacency columns for this contraction block
    # b_ref:   (1, TB*C_out)     bias tiled over the batch block (f32)
    # o_ref:   (K, TB*C_out)     lane-dense output block
    # acc_ref: (K, TB*C_out) f32 accumulator over the contraction (j) axis
    j = pl.program_id(1)
    nj = pl.num_programs(1)

    @pl.when(j == 0)
    def _():
        acc_ref[...] = jnp.zeros_like(acc_ref)

    TB, TKJ, C_in = x_ref.shape
    C_out = wt_ref.shape[1]

    # (1) Weight matmul: one MXU call over all TB*TKJ rows of this block.
    xs = x_ref[...].reshape(TB * TKJ, C_in)                    # leading merge
    support = jnp.dot(xs, wt_ref[...],
                      preferred_element_type=jnp.float32)       # (TB*TKJ, C_out)

    # (2) Move the batch index into lanes: (TB*TKJ, C_out) -> (TKJ, TB*C_out).
    #     Explicit slice + lane-concat relayout (TB pieces).
    s3 = support.reshape(TB, TKJ, C_out).astype(x_ref.dtype)    # leading split
    s2 = jnp.concatenate([s3[t] for t in range(TB)], axis=-1)   # (TKJ, TB*C_out)

    # (3) Single 2-D adjacency matmul, accumulated over j blocks.
    acc_ref[...] += jnp.dot(adj_ref[...], s2,
                            preferred_element_type=jnp.float32)  # (K, TB*C_out)

    @pl.when(j == nj - 1)
    def _():
        o_ref[...] = (acc_ref[...] + b_ref[...]).astype(o_ref.dtype)


# --------------------------------------------------------------------------- #
# Wrapper
# --------------------------------------------------------------------------- #
def graph_convolution(x, weight, adj, bias=None, compute_dtype=None):
    """x: (B, K, C_in); weight: (C_out, C_in) [torch Linear layout]; adj: (K, K);
    bias: (C_out,) or None.  Returns (B, K, C_out) in x.dtype."""
    B, K, C_in = x.shape
    C_out = weight.shape[0]
    out_dtype = x.dtype
    in_dtype = jnp.dtype(compute_dtype) if compute_dtype is not None else x.dtype

    # Layout glue done once, outside the kernel.
    x_c = x.astype(in_dtype)
    wt = weight.T.astype(in_dtype)                               # (C_in, C_out)
    adj_c = adj.astype(in_dtype)
    if bias is None:
        bias = jnp.zeros((C_out,), jnp.float32)

    cap = _vmem_capacity_bytes()
    in_b = jnp.dtype(in_dtype).itemsize
    out_b = jnp.dtype(out_dtype).itemsize
    TB, TKJ = _plan_blocks(B, K, C_in, C_out, in_b, out_b, cap)
    nb, nj = B // TB, K // TKJ

    # Bias tiled over the batch block so it broadcasts over the (K, TB*C_out) block.
    b2 = jnp.tile(bias.astype(jnp.float32), TB)[None, :]         # (1, TB*C_out)

    flops = 2 * B * K * C_out * (C_in + K)
    bytes_accessed = (x_c.size * in_b + wt.size * in_b + adj_c.size * in_b
                      + b2.size * 4 + B * K * C_out * out_b)
    needed = _footprint_bytes(TB, TKJ, K, C_in, C_out, in_b, out_b, nj)
    vmem_limit = _vmem_limit_bytes(needed, cap)

    def run(single_buffer):
        inv = dict(pipeline_mode=pl.Buffered(1)) if single_buffer else {}
        adj_inv = inv if nj == 1 else {}   # adj is only invariant when not j-tiled
        in_specs = [
            pl.BlockSpec((TB, TKJ, C_in), lambda b, j: (b, j, 0)),
            pl.BlockSpec((C_in, C_out), lambda b, j: (0, 0), **inv),
            pl.BlockSpec((K, TKJ), lambda b, j: (0, j), **adj_inv),
            pl.BlockSpec((1, TB * C_out), lambda b, j: (0, 0), **inv),
        ]
        out_spec = pl.BlockSpec((K, TB * C_out), lambda b, j: (0, b))
        call = pl.pallas_call(
            _gcn_kernel,
            out_shape=jax.ShapeDtypeStruct((K, B * C_out), out_dtype),
            grid_spec=pltpu.PrefetchScalarGridSpec(
                num_scalar_prefetch=0,
                grid=(nb, nj),
                in_specs=in_specs,
                out_specs=out_spec,
                scratch_shapes=[pltpu.VMEM((K, TB * C_out), jnp.float32)],
            ),
            compiler_params=pltpu.CompilerParams(
                dimension_semantics=("parallel", "arbitrary"),
                vmem_limit_bytes=vmem_limit,
            ),
            cost_estimate=pl.CostEstimate(
                flops=flops, transcendentals=0, bytes_accessed=bytes_accessed),
        )
        return call(x_c, wt, adj_c, b2)

    try:
        out2 = jax.block_until_ready(run(single_buffer=True))
    except Exception:
        # pl.Buffered(1) single-buffering of the grid-invariant operands is a
        # pure VMEM optimization; fall back to default double-buffering if this
        # JAX build rejects buffer_count=1.
        out2 = run(single_buffer=False)

    # (K, B*C_out) -> (B, K, C_out): pure XLA glue outside the kernel.
    return out2.reshape(K, B, C_out).transpose(1, 0, 2)


# --------------------------------------------------------------------------- #
# Self-test
# --------------------------------------------------------------------------- #
if __name__ == "__main__":
    B, K, C_in, C_out = 8, 8, 32, 16

    key = jax.random.PRNGKey(0)
    k_x, k_w, k_adj, k_b = jax.random.split(key, 4)

    x = jax.random.normal(k_x, (B, K, C_in), dtype=jnp.float32)
    weight = jax.random.normal(k_w, (C_out, C_in), dtype=jnp.float32) * 0.1  # (out, in)
    adj = jax.random.uniform(k_adj, (K, K), dtype=jnp.float32)
    bias = jax.random.normal(k_b, (C_out,), dtype=jnp.float32) * 0.1

    # f32 path (exact check).
    out = jax.block_until_ready(graph_convolution(x, weight, adj, bias))

    support_ref = jnp.einsum('bkc,oc->bko', x, weight)
    out_ref = jnp.einsum('kj,bjc->bkc', adj, support_ref) + bias
    assert out.shape == (B, K, C_out)
    assert jnp.allclose(out, out_ref, atol=1e-3, rtol=1e-3)

    # bf16 MXU path (inputs cast to bfloat16, f32 accumulation) — looser check.
    out_bf16 = jax.block_until_ready(
        graph_convolution(x, weight, adj, bias, compute_dtype=jnp.bfloat16))
    assert out_bf16.shape == (B, K, C_out)
    assert jnp.allclose(out_bf16, out_ref, atol=5e-2, rtol=5e-2)

    print("KERNEL_OK")
</pallas_src>

<mosaic_0001>
module attributes {stable_mosaic.version = 11 : i64} {
  func.func @_gcn_kernel(%arg0: i32, %arg1: i32, %arg2: memref<8x8x32xf32, #tpu.memory_space<vmem>>, %arg3: memref<32x16xf32, #tpu.memory_space<vmem>>, %arg4: memref<8x8xf32, #tpu.memory_space<vmem>>, %arg5: memref<1x128xf32, #tpu.memory_space<vmem>>, %arg6: memref<8x128xf32, #tpu.memory_space<vmem>>, %arg7: memref<8x128xf32, #tpu.memory_space<vmem>>) attributes {dimension_semantics = [#tpu.dimension_semantics<parallel>, #tpu.dimension_semantics<arbitrary>], iteration_bounds = array<i64: 1, 1>, scalar_prefetch = 0 : i64, scratch_operands = 1 : i64, tpu.core_type = #tpu.core_type<tc>, window_params = [{transform_indices = @transform_0, window_bounds = array<i64: 8, 8, 32>}, {pipeline_mode = #tpu.pipeline_mode<synchronous>, transform_indices = @transform_1, window_bounds = array<i64: 32, 16>}, {pipeline_mode = #tpu.pipeline_mode<synchronous>, transform_indices = @transform_2, window_bounds = array<i64: 8, 8>}, {pipeline_mode = #tpu.pipeline_mode<synchronous>, transform_indices = @transform_3, window_bounds = array<i64: 1, 128>}, {transform_indices = @transform_4, window_bounds = array<i64: 8, 128>}]} {
    %c0_i32 = arith.constant 0 : i32
    %0 = arith.cmpi eq, %arg1, %c0_i32 : i32
    %1 = arith.extui %0 : i1 to i32
    %c0_i32_0 = arith.constant 0 : i32
    %2 = arith.cmpi ne, %1, %c0_i32_0 : i32
    scf.if %2 {
      %cst_14 = arith.constant 0.000000e+00 : f32
      %33 = vector.broadcast %cst_14 : f32 to vector<8x128xf32>
      %c0_15 = arith.constant 0 : index
      %c0_16 = arith.constant 0 : index
      %34 = vector.load %arg7[%c0_15, %c0_16] : memref<8x128xf32, #tpu.memory_space<vmem>>, vector<8x128xf32>
      tpu.vector_store %arg7[%c0_15, %c0_16], %33 {strides = array<i32>} : memref<8x128xf32, #tpu.memory_space<vmem>>, vector<8x128xf32>,
    } else {
    }
    %c0 = arith.constant 0 : index
    %c0_1 = arith.constant 0 : index
    %c0_2 = arith.constant 0 : index
    %3 = vector.load %arg2[%c0, %c0_1, %c0_2] : memref<8x8x32xf32, #tpu.memory_space<vmem>>, vector<8x8x32xf32>
    %4 = vector.shape_cast %3 : vector<8x8x32xf32> to vector<64x32xf32>
    %c0_3 = arith.constant 0 : index
    %c0_4 = arith.constant 0 : index
    %5 = vector.load %arg3[%c0_3, %c0_4] : memref<32x16xf32, #tpu.memory_space<vmem>>, vector<32x16xf32>
    %cst = arith.constant dense<0.000000e+00> : vector<64x16xf32>
    %6 = tpu.matmul %4, %5, %cst {dimension_numbers = #tpu.dot_dimension_numbers<[1], [0], [0], [1], [0, 0, 1, 1], [], []>} : vector<64x32xf32>, vector<32x16xf32>, vector<64x16xf32> -> vector<64x16xf32>
    %7 = vector.shape_cast %6 : vector<64x16xf32> to vector<8x8x16xf32>
    %8 = vector.extract_strided_slice %7 {offsets = [0, 0, 0], sizes = [1, 8, 16], strides = [1, 1, 1]} : vector<8x8x16xf32> to vector<1x8x16xf32>
    %9 = vector.shape_cast %8 : vector<1x8x16xf32> to vector<8x16xf32>
    %10 = vector.extract_strided_slice %7 {offsets = [1, 0, 0], sizes = [1, 8, 16], strides = [1, 1, 1]} : vector<8x8x16xf32> to vector<1x8x16xf32>
    %11 = vector.shape_cast %10 : vector<1x8x16xf32> to vector<8x16xf32>
    %12 = vector.extract_strided_slice %7 {offsets = [2, 0, 0], sizes = [1, 8, 16], strides = [1, 1, 1]} : vector<8x8x16xf32> to vector<1x8x16xf32>
    %13 = vector.shape_cast %12 : vector<1x8x16xf32> to vector<8x16xf32>
    %14 = vector.extract_strided_slice %7 {offsets = [3, 0, 0], sizes = [1, 8, 16], strides = [1, 1, 1]} : vector<8x8x16xf32> to vector<1x8x16xf32>
    %15 = vector.shape_cast %14 : vector<1x8x16xf32> to vector<8x16xf32>
    %16 = vector.extract_strided_slice %7 {offsets = [4, 0, 0], sizes = [1, 8, 16], strides = [1, 1, 1]} : vector<8x8x16xf32> to vector<1x8x16xf32>
    %17 = vector.shape_cast %16 : vector<1x8x16xf32> to vector<8x16xf32>
    %18 = vector.extract_strided_slice %7 {offsets = [5, 0, 0], sizes = [1, 8, 16], strides = [1, 1, 1]} : vector<8x8x16xf32> to vector<1x8x16xf32>
    %19 = vector.shape_cast %18 : vector<1x8x16xf32> to vector<8x16xf32>
    %20 = vector.extract_strided_slice %7 {offsets = [6, 0, 0], sizes = [1, 8, 16], strides = [1, 1, 1]} : vector<8x8x16xf32> to vector<1x8x16xf32>
    %21 = vector.shape_cast %20 : vector<1x8x16xf32> to vector<8x16xf32>
    %22 = vector.extract_strided_slice %7 {offsets = [7, 0, 0], sizes = [1, 8, 16], strides = [1, 1, 1]} : vector<8x8x16xf32> to vector<1x8x16xf32>
    %23 = vector.shape_cast %22 : vector<1x8x16xf32> to vector<8x16xf32>
    %24 = tpu.concatenate %9, %11, %13, %15, %17, %19, %21, %23 in 1 : vector<8x16xf32>, vector<8x16xf32>, vector<8x16xf32>, vector<8x16xf32>, vector<8x16xf32>, vector<8x16xf32>, vector<8x16xf32>, vector<8x16xf32> -> vector<8x128xf32>
    %c0_5 = arith.constant 0 : index
    %c0_6 = arith.constant 0 : index
    %25 = vector.load %arg7[%c0_5, %c0_6] : memref<8x128xf32, #tpu.memory_space<vmem>>, vector<8x128xf32>
    %c0_7 = arith.constant 0 : index
    %c0_8 = arith.constant 0 : index
    %26 = vector.load %arg4[%c0_7, %c0_8] : memref<8x8xf32, #tpu.memory_space<vmem>>, vector<8x8xf32>
    %cst_9 = arith.constant dense<0.000000e+00> : vector<8x128xf32>
    %27 = tpu.matmul %26, %24, %cst_9 {dimension_numbers = #tpu.dot_dimension_numbers<[1], [0], [0], [1], [0, 0, 1, 1], [], []>} : vector<8x8xf32>, vector<8x128xf32>, vector<8x128xf32> -> vector<8x128xf32>
    %28 = arith.addf %25, %27 : vector<8x128xf32>
    %c0_10 = arith.constant 0 : index
    %c0_11 = arith.constant 0 : index
    %29 = vector.load %arg7[%c0_10, %c0_11] : memref<8x128xf32, #tpu.memory_space<vmem>>, vector<8x128xf32>
    tpu.vector_store %arg7[%c0_10, %c0_11], %28 {strides = array<i32>} : memref<8x128xf32, #tpu.memory_space<vmem>>, vector<8x128xf32>,
    %c0_i32_12 = arith.constant 0 : i32
    %30 = arith.cmpi eq, %arg1, %c0_i32_12 : i32
    %31 = arith.extui %30 : i1 to i32
    %c0_i32_13 = arith.constant 0 : i32
    %32 = arith.cmpi ne, %31, %c0_i32_13 : i32
    scf.if %32 {
      %c0_14 = arith.constant 0 : index
      %c0_15 = arith.constant 0 : index
      %33 = vector.load %arg7[%c0_14, %c0_15] : memref<8x128xf32, #tpu.memory_space<vmem>>, vector<8x128xf32>
      %c0_16 = arith.constant 0 : index
      %c0_17 = arith.constant 0 : index
      %34 = vector.load %arg5[%c0_16, %c0_17] : memref<1x128xf32, #tpu.memory_space<vmem>>, vector<1x128xf32>
      %35 = vector.broadcast %34 : vector<1x128xf32> to vector<8x128xf32>
      %36 = arith.addf %33, %35 : vector<8x128xf32>
      %c0_18 = arith.constant 0 : index
      %c0_19 = arith.constant 0 : index
      %37 = vector.load %arg6[%c0_18, %c0_19] : memref<8x128xf32, #tpu.memory_space<vmem>>, vector<8x128xf32>
      tpu.vector_store %arg6[%c0_18, %c0_19], %36 {strides = array<i32>} : memref<8x128xf32, #tpu.memory_space<vmem>>, vector<8x128xf32>,
    } else {
    }
    return
  }
  func.func @transform_0(%arg0: i32, %arg1: i32) -> (i32, i32, i32) {
    %c0_i32 = arith.constant 0 : i32
    %c0_i32_0 = arith.constant 0 : i32
    return %arg0, %arg1, %c0_i32 : i32, i32, i32
  }
  func.func @transform_1(%arg0: i32, %arg1: i32) -> (i32, i32) {
    %c0_i32 = arith.constant 0 : i32
    %c0_i32_0 = arith.constant 0 : i32
    %c0_i32_1 = arith.constant 0 : i32
    return %c0_i32, %c0_i32_0 : i32, i32
  }
  func.func @transform_2(%arg0: i32, %arg1: i32) -> (i32, i32) {
    %c0_i32 = arith.constant 0 : i32
    %c0_i32_0 = arith.constant 0 : i32
    return %c0_i32, %arg1 : i32, i32
  }
  func.func @transform_3(%arg0: i32, %arg1: i32) -> (i32, i32) {
    %c0_i32 = arith.constant 0 : i32
    %c0_i32_0 = arith.constant 0 : i32
    %c0_i32_1 = arith.constant 0 : i32
    return %c0_i32, %c0_i32_0 : i32, i32
  }
  func.func @transform_4(%arg0: i32, %arg1: i32) -> (i32, i32) {
    %c0_i32 = arith.constant 0 : i32
    %c0_i32_0 = arith.constant 0 : i32
    return %c0_i32, %arg0 : i32, i32
  }
}

module attributes {stable_mosaic.version = 11 : i64} {
  func.func @_gcn_kernel(%arg0: i32, %arg1: i32, %arg2: memref<8x8x32xf32, #tpu.memory_space<vmem>>, %arg3: memref<32x16xf32, #tpu.memory_space<vmem>>, %arg4: memref<8x8xf32, #tpu.memory_space<vmem>>, %arg5: memref<1x128xf32, #tpu.memory_space<vmem>>, %arg6: memref<8x128xf32, #tpu.memory_space<vmem>>, %arg7: memref<8x128xf32, #tpu.memory_space<vmem>>) attributes {dimension_semantics = [#tpu.dimension_semantics<parallel>, #tpu.dimension_semantics<arbitrary>], iteration_bounds = array<i64: 1, 1>, scalar_prefetch = 0 : i64, scratch_operands = 1 : i64, tpu.core_type = #tpu.core_type<tc>, window_params = [{transform_indices = @transform_0, window_bounds = array<i64: 8, 8, 32>}, {pipeline_mode = #tpu.pipeline_mode<synchronous>, transform_indices = @transform_1, window_bounds = array<i64: 32, 16>}, {transform_indices = @transform_2, window_bounds = array<i64: 8, 8>}, {pipeline_mode = #tpu.pipeline_mode<synchronous>, transform_indices = @transform_3, window_bounds = array<i64: 1, 128>}, {transform_indices = @transform_4, window_bounds = array<i64: 8, 128>}]} {
    %c0_i32 = arith.constant 0 : i32
    %0 = arith.cmpi eq, %arg1, %c0_i32 : i32
    %1 = arith.extui %0 : i1 to i32
    %c0_i32_0 = arith.constant 0 : i32
    %2 = arith.cmpi ne, %1, %c0_i32_0 : i32
    scf.if %2 {
      %cst_14 = arith.constant 0.000000e+00 : f32
      %33 = vector.broadcast %cst_14 : f32 to vector<8x128xf32>
      %c0_15 = arith.constant 0 : index
      %c0_16 = arith.constant 0 : index
      %34 = vector.load %arg7[%c0_15, %c0_16] : memref<8x128xf32, #tpu.memory_space<vmem>>, vector<8x128xf32>
      tpu.vector_store %arg7[%c0_15, %c0_16], %33 {strides = array<i32>} : memref<8x128xf32, #tpu.memory_space<vmem>>, vector<8x128xf32>,
    } else {
    }
    %c0 = arith.constant 0 : index
    %c0_1 = arith.constant 0 : index
    %c0_2 = arith.constant 0 : index
    %3 = vector.load %arg2[%c0, %c0_1, %c0_2] : memref<8x8x32xf32, #tpu.memory_space<vmem>>, vector<8x8x32xf32>
    %4 = vector.shape_cast %3 : vector<8x8x32xf32> to vector<64x32xf32>
    %c0_3 = arith.constant 0 : index
    %c0_4 = arith.constant 0 : index
    %5 = vector.load %arg3[%c0_3, %c0_4] : memref<32x16xf32, #tpu.memory_space<vmem>>, vector<32x16xf32>
    %cst = arith.constant dense<0.000000e+00> : vector<64x16xf32>
    %6 = tpu.matmul %4, %5, %cst {dimension_numbers = #tpu.dot_dimension_numbers<[1], [0], [0], [1], [0, 0, 1, 1], [], []>} : vector<64x32xf32>, vector<32x16xf32>, vector<64x16xf32> -> vector<64x16xf32>
    %7 = vector.shape_cast %6 : vector<64x16xf32> to vector<8x8x16xf32>
    %8 = vector.extract_strided_slice %7 {offsets = [0, 0, 0], sizes = [1, 8, 16], strides = [1, 1, 1]} : vector<8x8x16xf32> to vector<1x8x16xf32>
    %9 = vector.shape_cast %8 : vector<1x8x16xf32> to vector<8x16xf32>
    %10 = vector.extract_strided_slice %7 {offsets = [1, 0, 0], sizes = [1, 8, 16], strides = [1, 1, 1]} : vector<8x8x16xf32> to vector<1x8x16xf32>
    %11 = vector.shape_cast %10 : vector<1x8x16xf32> to vector<8x16xf32>
    %12 = vector.extract_strided_slice %7 {offsets = [2, 0, 0], sizes = [1, 8, 16], strides = [1, 1, 1]} : vector<8x8x16xf32> to vector<1x8x16xf32>
    %13 = vector.shape_cast %12 : vector<1x8x16xf32> to vector<8x16xf32>
    %14 = vector.extract_strided_slice %7 {offsets = [3, 0, 0], sizes = [1, 8, 16], strides = [1, 1, 1]} : vector<8x8x16xf32> to vector<1x8x16xf32>
    %15 = vector.shape_cast %14 : vector<1x8x16xf32> to vector<8x16xf32>
    %16 = vector.extract_strided_slice %7 {offsets = [4, 0, 0], sizes = [1, 8, 16], strides = [1, 1, 1]} : vector<8x8x16xf32> to vector<1x8x16xf32>
    %17 = vector.shape_cast %16 : vector<1x8x16xf32> to vector<8x16xf32>
    %18 = vector.extract_strided_slice %7 {offsets = [5, 0, 0], sizes = [1, 8, 16], strides = [1, 1, 1]} : vector<8x8x16xf32> to vector<1x8x16xf32>
    %19 = vector.shape_cast %18 : vector<1x8x16xf32> to vector<8x16xf32>
    %20 = vector.extract_strided_slice %7 {offsets = [6, 0, 0], sizes = [1, 8, 16], strides = [1, 1, 1]} : vector<8x8x16xf32> to vector<1x8x16xf32>
    %21 = vector.shape_cast %20 : vector<1x8x16xf32> to vector<8x16xf32>
    %22 = vector.extract_strided_slice %7 {offsets = [7, 0, 0], sizes = [1, 8, 16], strides = [1, 1, 1]} : vector<8x8x16xf32> to vector<1x8x16xf32>
    %23 = vector.shape_cast %22 : vector<1x8x16xf32> to vector<8x16xf32>
    %24 = tpu.concatenate %9, %11, %13, %15, %17, %19, %21, %23 in 1 : vector<8x16xf32>, vector<8x16xf32>, vector<8x16xf32>, vector<8x16xf32>, vector<8x16xf32>, vector<8x16xf32>, vector<8x16xf32>, vector<8x16xf32> -> vector<8x128xf32>
    %c0_5 = arith.constant 0 : index
    %c0_6 = arith.constant 0 : index
    %25 = vector.load %arg7[%c0_5, %c0_6] : memref<8x128xf32, #tpu.memory_space<vmem>>, vector<8x128xf32>
    %c0_7 = arith.constant 0 : index
    %c0_8 = arith.constant 0 : index
    %26 = vector.load %arg4[%c0_7, %c0_8] : memref<8x8xf32, #tpu.memory_space<vmem>>, vector<8x8xf32>
    %cst_9 = arith.constant dense<0.000000e+00> : vector<8x128xf32>
    %27 = tpu.matmul %26, %24, %cst_9 {dimension_numbers = #tpu.dot_dimension_numbers<[1], [0], [0], [1], [0, 0, 1, 1], [], []>} : vector<8x8xf32>, vector<8x128xf32>, vector<8x128xf32> -> vector<8x128xf32>
    %28 = arith.addf %25, %27 : vector<8x128xf32>
    %c0_10 = arith.constant 0 : index
    %c0_11 = arith.constant 0 : index
    %29 = vector.load %arg7[%c0_10, %c0_11] : memref<8x128xf32, #tpu.memory_space<vmem>>, vector<8x128xf32>
    tpu.vector_store %arg7[%c0_10, %c0_11], %28 {strides = array<i32>} : memref<8x128xf32, #tpu.memory_space<vmem>>, vector<8x128xf32>,
    %c0_i32_12 = arith.constant 0 : i32
    %30 = arith.cmpi eq, %arg1, %c0_i32_12 : i32
    %31 = arith.extui %30 : i1 to i32
    %c0_i32_13 = arith.constant 0 : i32
    %32 = arith.cmpi ne, %31, %c0_i32_13 : i32
    scf.if %32 {
      %c0_14 = arith.constant 0 : index
      %c0_15 = arith.constant 0 : index
      %33 = vector.load %arg7[%c0_14, %c0_15] : memref<8x128xf32, #tpu.memory_space<vmem>>, vector<8x128xf32>
      %c0_16 = arith.constant 0 : index
      %c0_17 = arith.constant 0 : index
      %34 = vector.load %arg5[%c0_16, %c0_17] : memref<1x128xf32, #tpu.memory_space<vmem>>, vector<1x128xf32>
      %35 = vector.broadcast %34 : vector<1x128xf32> to vector<8x128xf32>
      %36 = arith.addf %33, %35 : vector<8x128xf32>
      %c0_18 = arith.constant 0 : index
      %c0_19 = arith.constant 0 : index
      %37 = vector.load %arg6[%c0_18, %c0_19] : memref<8x128xf32, #tpu.memory_space<vmem>>, vector<8x128xf32>
      tpu.vector_store %arg6[%c0_18, %c0_19], %36 {strides = array<i32>} : memref<8x128xf32, #tpu.memory_space<vmem>>, vector<8x128xf32>,
    } else {
    }
    return
  }
  func.func @transform_0(%arg0: i32, %arg1: i32) -> (i32, i32, i32) {
    %c0_i32 = arith.constant 0 : i32
    %c0_i32_0 = arith.constant 0 : i32
    return %arg0, %arg1, %c0_i32 : i32, i32, i32
  }
  func.func @transform_1(%arg0: i32, %arg1: i32) -> (i32, i32) {
    %c0_i32 = arith.constant 0 : i32
    %c0_i32_0 = arith.constant 0 : i32
    %c0_i32_1 = arith.constant 0 : i32
    return %c0_i32, %c0_i32_0 : i32, i32
  }
  func.func @transform_2(%arg0: i32, %arg1: i32) -> (i32, i32) {
    %c0_i32 = arith.constant 0 : i32
    %c0_i32_0 = arith.constant 0 : i32
    return %c0_i32, %arg1 : i32, i32
  }
  func.func @transform_3(%arg0: i32, %arg1: i32) -> (i32, i32) {
    %c0_i32 = arith.constant 0 : i32
    %c0_i32_0 = arith.constant 0 : i32
    %c0_i32_1 = arith.constant 0 : i32
    return %c0_i32, %c0_i32_0 : i32, i32
  }
  func.func @transform_4(%arg0: i32, %arg1: i32) -> (i32, i32) {
    %c0_i32 = arith.constant 0 : i32
    %c0_i32_0 = arith.constant 0 : i32
    return %c0_i32, %arg0 : i32, i32
  }
}

</mosaic_0001>

<bundles_post_ra>
// kernel: tpu_custom_call.1
= control target key start
LH: loop header
LB: loop body
LE: loop exit
PB: predicated region body
PF: predicated region fallthrough
CT: control target
= control target key end

     0   :  { %9 = vsyncpa [#allocation4], 0  ;;  %s537_s0 = inlined_call_operand.hbm [shape: f32[8,8,32], index: 0, kind: input, shape index: {}]   ;;  %s538_s1 = inlined_call_operand.vmem [shape: f32[32,16], index: 1, kind: input, shape index: {}]   ;;  %s539_s2 = inlined_call_operand.vmem [shape: f32[8,8], index: 2, kind: input, shape index: {}]   ;;  %s540_s3 = inlined_call_operand.vmem [shape: f32[1,128], index: 3, kind: input, shape index: {}]   ;;  %s541_s4 = inlined_call_operand.hbm [shape: f32[8,128], index: 4, kind: output, shape index: {}]  }
   0x1   :  { %10 = vsyncpa [#allocation5], 0  ;;  %s448_s15 = smov [#allocation3]   ;;  %s400_s19 = scalar_lea.hbm %s537_s0, 1024 }
   0x2   :  { %s16_s16 = sshll.u32 %s448_s15, 4  ;;  %p401_p0 = scmp.ne.s32.totalorder %s537_s0, %s400_s19  ;;  %s17_s16 = int_to_ptr.vmem [resolvable:$true] %s16_s16 }
   0x3   :  { %p404_p1 = scmp.lt.u32.totalorder %s400_s19, %s537_s0 }
   0x5   :  { %p406_p2 = pnand %p404_p1, %p401_p0 }
   0x7   :  { %409 = shalt.err (!%p406_p2)
}
   0x8   :  { %s410_s24 = scalar_lea.vmem %s17_s16, 1024  ;;  %p415_p4 = scmp.lt.s32.totalorder %s17_s16, %s17_s16 }
   0x9   :  { %p411_p3 = scmp.ne.s32.totalorder %s17_s16, %s410_s24  ;;  %p416_p5 = scmp.lt.s32.totalorder %s410_s24, %s410_s24 }
   0xb   :  { %p417_p6 = por %p416_p5, %p415_p4 }
   0xd   :  { %p418_p7 = pnand %p417_p6, %p411_p3 }
   0xf   :  { %421 = shalt.err (!%p418_p7)
}
  0x10   :  { %s449_s25 = smov 128   ;;  %s450_s26 = smov 8  }
  0x11   :  { %22 = dma.hbm_to_vmem [thread:$0]  %s537_s0, 1024, %s17_s16, [#allocation4], %s449_s25, %s449_s25, %s450_s26  }
  0x12   :  { %444 = dma.done.wait [#allocation4], 1024  }
  0x13   :  { %445 = vsyncadd [#allocation4], 4294966272  ;;  %vm49_vm0 = vcmask 261120   ;;  %v45_v0 = vld [vmem:[%s538_s1] sm:$0xff]  ;;  %v46_v1 = vld [vmem:[%s538_s1 + $0x8] sm:$0xff]  ;;  %s451_s0 = smov 16  }
  0x14   :  { %v47_v2 = vld [vmem:[%s538_s1 + $0x10] sm:$0xff]  ;;  %v375_v3 = vpack.c.bf16 %v46_v1, %v45_v0  ;;  %v48_v4 = vld [vmem:[%s538_s1 + $0x18] sm:$0xff]  ;;  %v37_v5 = vld [vmem:[#allocation3] sm:$0xff]  ;;  %v452_v18 = vmov 0.0   ;;  %vm453_vm1 = vmmov 0   ;;  %s454_s1 = smov 48  }
  0x15   :  { %v379_v6 = vpack.c.bf16 %v48_v4, %v47_v2  ;;  %358 = vmatprep.mubr.msk.f32.mxu0 %vm49_vm0, %v37_v5  ;;  %v43_v7 = vld [vmem:[#allocation3 + $0x30] sm:$0xff]  ;;  %v38_v8 = vld [vmem:[#allocation3 + $0x8] sm:$0xff]  ;;  %v44_v9 = vld [vmem:[#allocation3 + $0x38] sm:$0xff]  ;;  %s455_s11 = smov 32   ;;  %s456_s12 = smov 80   ;;  %vm207_vm2 = vcmask 130048  }
  0x16   :  { %376 = vmatprep.subr.bf16.mxu0 %v375_v3  ;;  %383 = vmatprep.subr.bf16.mxu1 %v375_v3  ;;  %v39_v10 = vld [vmem:[#allocation3 + $0x10] sm:$0xff]  ;;  %v40_v11 = vld [vmem:[#allocation3 + $0x18] sm:$0xff]  ;;  %v41_v12 = vld [vmem:[#allocation3 + $0x20] sm:$0xff]  ;;  %s457_s13 = smov 64   ;;  %s458_s14 = smov 112   ;;  %vm210_vm3 = vcmask 392192  }
  0x17   :  { %378 = vmatpush3.bf16.msra.mxu0 %v375_v3  ;;  %385 = vmatpush3.bf16.msra.mxu1 %v375_v3  ;;  %v42_v13 = vld [vmem:[#allocation3 + $0x28] sm:$0xff]  ;;  %s459_s15 = smov 96   ;;  %vm212_vm4 = vcmask 523264   ;;  %vm214_vm5 = vcmask 654336   ;;  %vm216_vm6 = vcmask 785408   ;;  %vm218_vm7 = vcmask 916480  }
  0x18   :  { %380 = vmatprep.subr.bf16.mxu0 %v379_v6  ;;  %384 = vmatprep.subr.bf16.mxu1 %v379_v6  ;;  %v221_v36 = vld [vmem:[%s539_s2] sm:$0xff]  ;;  %vm222_vm8 = vcmask 64512   ;;  %s460_s20 = smov [#allocation6]  }
  0x19   :  { %367 = vmatprep.mubr.msk.f32.mxu1 %vm49_vm0, %v43_v7  ;;  %v335_v38 = vld [vmem:[%s540_s3] ss:$0 sm:$0xff]  ;;  %s317_s21 = sshll.u32 %s460_s20, 4  ;;  %s318_s21 = int_to_ptr.vmem [resolvable:$true] %s317_s21 }
  0x1a   :  { %s422_s22 = scalar_lea.vmem %s318_s21, 128  ;;  %p427_p9 = scmp.lt.s32.totalorder %s318_s21, %s318_s21 }
  0x1b   :  { %382 = vmatpush3.bf16.msra.mxu0 %v379_v6  ;;  %386 = vmatpush3.bf16.msra.mxu1 %v379_v6  ;;  %p423_p8 = scmp.ne.s32.totalorder %s318_s21, %s422_s22  ;;  %p428_p10 = scmp.lt.s32.totalorder %s422_s22, %s422_s22 }
  0x1c   :  { %370 = vmatprep.subr.mxu1 %v452_v18 }
  0x1d   :  { %p429_p11 = por %p428_p10, %p427_p9 }
  0x1e   :  { %359 = vmatmul.mubr.msk.f32.vlgmr.msra.gmra.mrb[0].mxu0 %vm49_vm0, %v38_v8  ;;  %368 = vmatmul.mubr.msk.f32.vlgmr.msra.gmra.mrb[0].mxu1 %vm49_vm0, %v44_v9 }
  0x1f   :  { %361 = vmatprep.mubr.msk.f32.mxu0 %vm49_vm0, %v39_v10  ;;  %372 = vmatprep.mubr.msk.f32.mxu1 %vm453_vm1, %v452_v18  ;;  %p430_p12 = pnand %p429_p11, %p423_p8 }
  0x22   :  { %362 = vmatmul.mubr.msk.f32.gmra.mrb[2].mxu0 %vm49_vm0, %v40_v11 }
  0x23   :  { %364 = vmatprep.mubr.msk.f32.mxu0 %vm49_vm0, %v41_v12 }
  0x26   :  { %365 = vmatmul.mubr.msk.f32.gmra.mrb[4].mxu0 %vm49_vm0, %v42_v13 }
  0xf1   :  { %v360_v14 = vpop.f32.mrb[0].mxu0  ;;  %v369_v15 = vpop.f32.mrb[0].mxu1 }
  0xf2   :  { %180 = vrot.lane.b32.xlu0 %v360_v14, %s451_s0  ;;  %v140_v16 = vpop.f32.mrb[1].mxu0  ;;  %v170_v17 = vpop.f32.mrb[1].mxu1 }
  0xf5   :  { %v363_v19 = vpop.f32.mrb[2].mxu0 }
  0xf6   :  { %188 = vrot.lane.b32.xlu1 %v363_v19, %s454_s1  ;;  %v150_v20 = vpop.f32.mrb[3].mxu0 }
  0xf7   :  { %184 = vrot.lane.b32.xlu0 %v150_v20, %s455_s11 }
  0xf9   :  { %v366_v21 = vpop.f32.mrb[4].mxu0 }
  0xfa   :  { %v160_v22 = vpop.f32.mrb[5].mxu0 }
  0xfb   :  { %196 = vrot.lane.b32.xlu0 %v366_v21, %s456_s12  ;;  %192 = vrot.lane.b32.xlu1 %v160_v22, %s457_s13 }
  0xff   :  { %204 = vrot.lane.b32.xlu0 %v369_v15, %s458_s14  ;;  %200 = vrot.lane.b32.xlu1 %v170_v17, %s459_s15 }
 0x164   :  { %v181_v23 = vpop.permute.xlu0 %180 }
 0x165   :  { %v208_v25 = vsel %vm207_vm2, %v140_v16, %v181_v23 }
 0x168   :  { %v189_v24 = vpop.permute.xlu1 %188 }
 0x169   :  { %v185_v26 = vpop.permute.xlu0 %184 }
 0x16a   :  { %v209_v27 = vsel %vm49_vm0, %v208_v25, %v185_v26 }
 0x16b   :  { %v211_v29 = vsel %vm210_vm3, %v209_v27, %v189_v24 }
 0x16d   :  { %v197_v28 = vpop.permute.xlu0 %196  ;;  %v193_v30 = vpop.permute.xlu1 %192 }
 0x16e   :  { %v213_v31 = vsel %vm212_vm4, %v211_v29, %v193_v30 }
 0x16f   :  { %v215_v33 = vsel %vm214_vm5, %v213_v31, %v197_v28 }
 0x171   :  { %v205_v32 = vpop.permute.xlu0 %204  ;;  %v201_v34 = vpop.permute.xlu1 %200 }
 0x172   :  { %v217_v35 = vsel %vm216_vm6, %v215_v33, %v201_v34 }
 0x173   :  { %v219_v37 = vsel %vm218_vm7, %v217_v35, %v205_v32 }
 0x174   :  { %371 = vmatpush3.msra.mxu1 %v219_v37 }
 0x175   :  { %373 = vmatmul.mubr.msk.f32.vlgmr.msra.gmra.mrb[2].mxu1 %vm222_vm8, %v221_v36 }
 0x248   :  { %v292_v39 = vpop.f32.mrb[2].mxu1 }
 0x249   :  { %v309_v40 = vadd.f32 %v335_v38, %v292_v39  ;;  %v374_v41 = vpop.f32.mrb[3].mxu1 }
 0x24b   :  { %310 = vst [vmem:[#allocation6] sm:$0xff] %v309_v40 }
 0x24c   :  { %433 = shalt.err (!%p430_p12)
}
 0x24d   :  { %s434_s24 = scalar_lea.hbm %s541_s4, 128 }
 0x24e   :  { %p435_p13 = scmp.ne.s32.totalorder %s541_s4, %s434_s24  ;;  %p438_p0 = scmp.lt.u32.totalorder %s434_s24, %s541_s4 }
 0x250   :  { %p440_p1 = pnand %p438_p0, %p435_p13 }
 0x252   :  { %443 = shalt.err (!%p440_p1)
}
 0x253   :  { %320 = dma.vmem_to_hbm [thread:$0]  %s318_s21, 128, %s541_s4, [#allocation5]  }
 0x254   :  { %446 = dma.done.wait [#allocation5], 128  }
 0x255   :  { %447 = vsyncadd [#allocation5], 4294967168 }
 0x256   :  { %324 = vsyncpa [#allocation4], 1 }
 0x257   :  { %325 = vsyncpa [#allocation5], 1 }

// kernel: tpu_custom_call.1
= control target key start
LH: loop header
LB: loop body
LE: loop exit
PB: predicated region body
PF: predicated region fallthrough
CT: control target
= control target key end

     0   :  { %9 = vsyncpa [#allocation4], 0  ;;  %s537_s0 = inlined_call_operand.hbm [shape: f32[8,8,32], index: 0, kind: input, shape index: {}]   ;;  %s538_s1 = inlined_call_operand.vmem [shape: f32[32,16], index: 1, kind: input, shape index: {}]   ;;  %s539_s2 = inlined_call_operand.vmem [shape: f32[8,8], index: 2, kind: input, shape index: {}]   ;;  %s540_s3 = inlined_call_operand.vmem [shape: f32[1,128], index: 3, kind: input, shape index: {}]   ;;  %s541_s4 = inlined_call_operand.hbm [shape: f32[8,128], index: 4, kind: output, shape index: {}]  }
   0x1   :  { %10 = vsyncpa [#allocation5], 0  ;;  %s448_s15 = smov [#allocation3]   ;;  %s400_s19 = scalar_lea.hbm %s537_s0, 1024 }
   0x2   :  { %s16_s16 = sshll.u32 %s448_s15, 4  ;;  %p401_p0 = scmp.ne.s32.totalorder %s537_s0, %s400_s19  ;;  %s17_s16 = int_to_ptr.vmem [resolvable:$true] %s16_s16 }
   0x3   :  { %p404_p1 = scmp.lt.u32.totalorder %s400_s19, %s537_s0 }
   0x5   :  { %p406_p2 = pnand %p404_p1, %p401_p0 }
   0x7   :  { %409 = shalt.err (!%p406_p2)
}
   0x8   :  { %s410_s24 = scalar_lea.vmem %s17_s16, 1024  ;;  %p415_p4 = scmp.lt.s32.totalorder %s17_s16, %s17_s16 }
   0x9   :  { %p411_p3 = scmp.ne.s32.totalorder %s17_s16, %s410_s24  ;;  %p416_p5 = scmp.lt.s32.totalorder %s410_s24, %s410_s24 }
   0xb   :  { %p417_p6 = por %p416_p5, %p415_p4 }
   0xd   :  { %p418_p7 = pnand %p417_p6, %p411_p3 }
   0xf   :  { %421 = shalt.err (!%p418_p7)
}
  0x10   :  { %s449_s25 = smov 128   ;;  %s450_s26 = smov 8  }
  0x11   :  { %22 = dma.hbm_to_vmem [thread:$0]  %s537_s0, 1024, %s17_s16, [#allocation4], %s449_s25, %s449_s25, %s450_s26  }
  0x12   :  { %444 = dma.done.wait [#allocation4], 1024  }
  0x13   :  { %445 = vsyncadd [#allocation4], 4294966272  ;;  %vm49_vm0 = vcmask 261120   ;;  %v45_v0 = vld [vmem:[%s538_s1] sm:$0xff]  ;;  %v46_v1 = vld [vmem:[%s538_s1 + $0x8] sm:$0xff]  ;;  %s451_s0 = smov 16  }
  0x14   :  { %v47_v2 = vld [vmem:[%s538_s1 + $0x10] sm:$0xff]  ;;  %v375_v3 = vpack.c.bf16 %v46_v1, %v45_v0  ;;  %v48_v4 = vld [vmem:[%s538_s1 + $0x18] sm:$0xff]  ;;  %v37_v5 = vld [vmem:[#allocation3] sm:$0xff]  ;;  %v452_v18 = vmov 0.0   ;;  %vm453_vm1 = vmmov 0   ;;  %s454_s1 = smov 48  }
  0x15   :  { %v379_v6 = vpack.c.bf16 %v48_v4, %v47_v2  ;;  %358 = vmatprep.mubr.msk.f32.mxu0 %vm49_vm0, %v37_v5  ;;  %v43_v7 = vld [vmem:[#allocation3 + $0x30] sm:$0xff]  ;;  %v38_v8 = vld [vmem:[#allocation3 + $0x8] sm:$0xff]  ;;  %v44_v9 = vld [vmem:[#allocation3 + $0x38] sm:$0xff]  ;;  %s455_s11 = smov 32   ;;  %s456_s12 = smov 80   ;;  %vm207_vm2 = vcmask 130048  }
  0x16   :  { %376 = vmatprep.subr.bf16.mxu0 %v375_v3  ;;  %383 = vmatprep.subr.bf16.mxu1 %v375_v3  ;;  %v39_v10 = vld [vmem:[#allocation3 + $0x10] sm:$0xff]  ;;  %v40_v11 = vld [vmem:[#allocation3 + $0x18] sm:$0xff]  ;;  %v41_v12 = vld [vmem:[#allocation3 + $0x20] sm:$0xff]  ;;  %s457_s13 = smov 64   ;;  %s458_s14 = smov 112   ;;  %vm210_vm3 = vcmask 392192  }
  0x17   :  { %378 = vmatpush3.bf16.msra.mxu0 %v375_v3  ;;  %385 = vmatpush3.bf16.msra.mxu1 %v375_v3  ;;  %v42_v13 = vld [vmem:[#allocation3 + $0x28] sm:$0xff]  ;;  %s459_s15 = smov 96   ;;  %vm212_vm4 = vcmask 523264   ;;  %vm214_vm5 = vcmask 654336   ;;  %vm216_vm6 = vcmask 785408   ;;  %vm218_vm7 = vcmask 916480  }
  0x18   :  { %380 = vmatprep.subr.bf16.mxu0 %v379_v6  ;;  %384 = vmatprep.subr.bf16.mxu1 %v379_v6  ;;  %v221_v36 = vld [vmem:[%s539_s2] sm:$0xff]  ;;  %vm222_vm8 = vcmask 64512   ;;  %s460_s20 = smov [#allocation6]  }
  0x19   :  { %367 = vmatprep.mubr.msk.f32.mxu1 %vm49_vm0, %v43_v7  ;;  %v335_v38 = vld [vmem:[%s540_s3] ss:$0 sm:$0xff]  ;;  %s317_s21 = sshll.u32 %s460_s20, 4  ;;  %s318_s21 = int_to_ptr.vmem [resolvable:$true] %s317_s21 }
  0x1a   :  { %s422_s22 = scalar_lea.vmem %s318_s21, 128  ;;  %p427_p9 = scmp.lt.s32.totalorder %s318_s21, %s318_s21 }
  0x1b   :  { %382 = vmatpush3.bf16.msra.mxu0 %v379_v6  ;;  %386 = vmatpush3.bf16.msra.mxu1 %v379_v6  ;;  %p423_p8 = scmp.ne.s32.totalorder %s318_s21, %s422_s22  ;;  %p428_p10 = scmp.lt.s32.totalorder %s422_s22, %s422_s22 }
  0x1c   :  { %370 = vmatprep.subr.mxu1 %v452_v18 }
  0x1d   :  { %p429_p11 = por %p428_p10, %p427_p9 }
  0x1e   :  { %359 = vmatmul.mubr.msk.f32.vlgmr.msra.gmra.mrb[0].mxu0 %vm49_vm0, %v38_v8  ;;  %368 = vmatmul.mubr.msk.f32.vlgmr.msra.gmra.mrb[0].mxu1 %vm49_vm0, %v44_v9 }
  0x1f   :  { %361 = vmatprep.mubr.msk.f32.mxu0 %vm49_vm0, %v39_v10  ;;  %372 = vmatprep.mubr.msk.f32.mxu1 %vm453_vm1, %v452_v18  ;;  %p430_p12 = pnand %p429_p11, %p423_p8 }
  0x22   :  { %362 = vmatmul.mubr.msk.f32.gmra.mrb[2].mxu0 %vm49_vm0, %v40_v11 }
  0x23   :  { %364 = vmatprep.mubr.msk.f32.mxu0 %vm49_vm0, %v41_v12 }
  0x26   :  { %365 = vmatmul.mubr.msk.f32.gmra.mrb[4].mxu0 %vm49_vm0, %v42_v13 }
  0xf1   :  { %v360_v14 = vpop.f32.mrb[0].mxu0  ;;  %v369_v15 = vpop.f32.mrb[0].mxu1 }
  0xf2   :  { %180 = vrot.lane.b32.xlu0 %v360_v14, %s451_s0  ;;  %v140_v16 = vpop.f32.mrb[1].mxu0  ;;  %v170_v17 = vpop.f32.mrb[1].mxu1 }
  0xf5   :  { %v363_v19 = vpop.f32.mrb[2].mxu0 }
  0xf6   :  { %188 = vrot.lane.b32.xlu1 %v363_v19, %s454_s1  ;;  %v150_v20 = vpop.f32.mrb[3].mxu0 }
  0xf7   :  { %184 = vrot.lane.b32.xlu0 %v150_v20, %s455_s11 }
  0xf9   :  { %v366_v21 = vpop.f32.mrb[4].mxu0 }
  0xfa   :  { %v160_v22 = vpop.f32.mrb[5].mxu0 }
  0xfb   :  { %196 = vrot.lane.b32.xlu0 %v366_v21, %s456_s12  ;;  %192 = vrot.lane.b32.xlu1 %v160_v22, %s457_s13 }
  0xff   :  { %204 = vrot.lane.b32.xlu0 %v369_v15, %s458_s14  ;;  %200 = vrot.lane.b32.xlu1 %v170_v17, %s459_s15 }
 0x164   :  { %v181_v23 = vpop.permute.xlu0 %180 }
 0x165   :  { %v208_v25 = vsel %vm207_vm2, %v140_v16, %v181_v23 }
 0x168   :  { %v189_v24 = vpop.permute.xlu1 %188 }
 0x169   :  { %v185_v26 = vpop.permute.xlu0 %184 }
 0x16a   :  { %v209_v27 = vsel %vm49_vm0, %v208_v25, %v185_v26 }
 0x16b   :  { %v211_v29 = vsel %vm210_vm3, %v209_v27, %v189_v24 }
 0x16d   :  { %v197_v28 = vpop.permute.xlu0 %196  ;;  %v193_v30 = vpop.permute.xlu1 %192 }
 0x16e   :  { %v213_v31 = vsel %vm212_vm4, %v211_v29, %v193_v30 }
 0x16f   :  { %v215_v33 = vsel %vm214_vm5, %v213_v31, %v197_v28 }
 0x171   :  { %v205_v32 = vpop.permute.xlu0 %204  ;;  %v201_v34 = vpop.permute.xlu1 %200 }
 0x172   :  { %v217_v35 = vsel %vm216_vm6, %v215_v33, %v201_v34 }
 0x173   :  { %v219_v37 = vsel %vm218_vm7, %v217_v35, %v205_v32 }
 0x174   :  { %371 = vmatpush3.msra.mxu1 %v219_v37 }
 0x175   :  { %373 = vmatmul.mubr.msk.f32.vlgmr.msra.gmra.mrb[2].mxu1 %vm222_vm8, %v221_v36 }
 0x248   :  { %v292_v39 = vpop.f32.mrb[2].mxu1 }
 0x249   :  { %v309_v40 = vadd.f32 %v335_v38, %v292_v39  ;;  %v374_v41 = vpop.f32.mrb[3].mxu1 }
 0x24b   :  { %310 = vst [vmem:[#allocation6] sm:$0xff] %v309_v40 }
 0x24c   :  { %433 = shalt.err (!%p430_p12)
}
 0x24d   :  { %s434_s24 = scalar_lea.hbm %s541_s4, 128 }
 0x24e   :  { %p435_p13 = scmp.ne.s32.totalorder %s541_s4, %s434_s24  ;;  %p438_p0 = scmp.lt.u32.totalorder %s434_s24, %s541_s4 }
 0x250   :  { %p440_p1 = pnand %p438_p0, %p435_p13 }
 0x252   :  { %443 = shalt.err (!%p440_p1)
}
 0x253   :  { %320 = dma.vmem_to_hbm [thread:$0]  %s318_s21, 128, %s541_s4, [#allocation5]  }
 0x254   :  { %446 = dma.done.wait [#allocation5], 128  }
 0x255   :  { %447 = vsyncadd [#allocation5], 4294967168 }
 0x256   :  { %324 = vsyncpa [#allocation4], 1 }
 0x257   :  { %325 = vsyncpa [#allocation5], 1 }

</bundles_post_ra>
